<compile_context>
chip_gen: v5e
topology: v5e:2x2
jax: 0.10.0
libtpu: 0.0.40
codegen_flags: <defaults>
</compile_context>

<pallas_src>
import jax
import jax.numpy as jnp
from jax.experimental import pallas as pl
from jax.experimental.pallas import tpu as pltpu

C_IN, C_HID, N_DISC = 256, 128, 100
KH = KW = 4
K_FLAT = C_IN * KH * KW          # 4096
TK = 1024                        # conv1 reduction tile (4 grid steps)
HEAD_W = 128                     # fused head width: 100 disc + 1 mu + 1 var + 26 pad
MU_COL = N_DISC                  # 100
VAR_COL = N_DISC + 1             # 101
BN_EPS = 1e-5
LRELU_SLOPE = 0.1


def qhead_kernel(x_ref, w1_ref, gamma_ref, beta_ref, wh_ref, bh_ref,
                 out_ref, acc_ref):
    k = pl.program_id(0)

    # ---- conv1 accumulation over the K (=C*H*W) reduction axis -------------
    @pl.when(k == 0)
    def _():
        acc_ref[...] = jnp.zeros_like(acc_ref)

    # bf16 x bf16 -> f32 accumulate on the MXU.
    acc_ref[...] += jnp.dot(x_ref[...], w1_ref[...],
                            preferred_element_type=jnp.float32)

    # ---- finalize: BN (batch stats) + leaky_relu + fused heads --------------
    @pl.when(k == pl.num_programs(0) - 1)
    def _():
        h = acc_ref[...]                                          # (N, 128) f32
        mean = jnp.mean(h, axis=0, keepdims=True)                 # (1, 128)
        var_b = jnp.mean((h - mean) * (h - mean), axis=0, keepdims=True)
        h = (h - mean) * jax.lax.rsqrt(var_b + BN_EPS)
        h = h * gamma_ref[...] + beta_ref[...]
        a = jnp.where(h >= 0, h, LRELU_SLOPE * h)                 # LeakyReLU(0.1)

        # One lane-dense 128-wide head matmul: [disc(100) | mu | var | pad].
        head = jnp.dot(a, wh_ref[...], preferred_element_type=jnp.float32)
        head = head + bh_ref[...]

        # exp() only on the variance column (EUP + select; output stays dense).
        col = jax.lax.broadcasted_iota(jnp.int32, head.shape, 1)
        out_ref[...] = jnp.where(col == VAR_COL, jnp.exp(head), head)


def pack_params(params):
    """One-time layout/dtype packing of the PyTorch-style parameters."""
    w1 = params["w1"].reshape(C_HID, K_FLAT).T.astype(jnp.bfloat16)   # (4096,128)

    wd_t = params["wd"].reshape(N_DISC, C_HID).T                      # (128,100)
    wm_t = params["wm"].reshape(1, C_HID).T                           # (128,1)
    wv_t = params["wv"].reshape(1, C_HID).T                           # (128,1)
    pad_w = jnp.zeros((C_HID, HEAD_W - N_DISC - 2), jnp.float32)
    w_head = jnp.concatenate([wd_t, wm_t, wv_t, pad_w], axis=1)       # (128,128)

    b_head = jnp.concatenate([
        params["bd"].reshape(N_DISC).astype(jnp.float32),
        params["bm"].reshape(1).astype(jnp.float32),
        params["bv"].reshape(1).astype(jnp.float32),
        jnp.zeros((HEAD_W - N_DISC - 2,), jnp.float32),
    ]).reshape(1, HEAD_W)

    return {
        "w1": w1,
        "gamma": params["bn_gamma"].reshape(1, C_HID).astype(jnp.float32),
        "beta": params["bn_beta"].reshape(1, C_HID).astype(jnp.float32),
        "w_head": w_head.astype(jnp.float32),
        "b_head": b_head,
    }


@jax.jit
def qhead_forward(x_nchw, packed):
    """x_nchw: (N, 256, 4, 4) float32, packed: output of pack_params().

    Returns (disc_logits (N,100), mu (N,), var (N,))."""
    n = x_nchw.shape[0]
    x_flat = x_nchw.reshape(n, K_FLAT).astype(jnp.bfloat16)
    n_k = K_FLAT // TK

    head = pl.pallas_call(
        qhead_kernel,
        grid=(n_k,),
        in_specs=[
            pl.BlockSpec((n, TK), lambda k: (0, k)),          # x tile
            pl.BlockSpec((TK, C_HID), lambda k: (k, 0)),      # w1 tile (bf16)
            pl.BlockSpec((1, C_HID), lambda k: (0, 0)),       # gamma
            pl.BlockSpec((1, C_HID), lambda k: (0, 0)),       # beta
            pl.BlockSpec((C_HID, HEAD_W), lambda k: (0, 0)),  # fused head weight
            pl.BlockSpec((1, HEAD_W), lambda k: (0, 0)),      # fused head bias
        ],
        out_specs=pl.BlockSpec((n, HEAD_W), lambda k: (0, 0)),
        out_shape=jax.ShapeDtypeStruct((n, HEAD_W), jnp.float32),
        scratch_shapes=[pltpu.VMEM((n, C_HID), jnp.float32)],  # conv1 accumulator
        compiler_params=pltpu.CompilerParams(
            dimension_semantics=("arbitrary",)),               # reduction axis
        cost_estimate=pl.CostEstimate(
            flops=2 * n * K_FLAT * C_HID + 2 * n * C_HID * HEAD_W,
            transcendentals=n * HEAD_W,
            bytes_accessed=(n * K_FLAT * 2 + K_FLAT * C_HID * 2
                            + C_HID * HEAD_W * 4 + HEAD_W * 4
                            + 2 * C_HID * 4 + n * HEAD_W * 4),
        ),
    )(x_flat, packed["w1"], packed["gamma"], packed["beta"],
      packed["w_head"], packed["b_head"])

    # .squeeze() semantics (N > 1): (N,100,1,1)->(N,100), (N,1,1,1)->(N,)
    disc = head[:, :N_DISC]
    mu = head[:, MU_COL]
    var = head[:, VAR_COL]
    return disc, mu, var


def _bn_lrelu_heads(h, params):
    mean = jnp.mean(h, axis=0, keepdims=True)
    var_b = jnp.mean((h - mean) ** 2, axis=0, keepdims=True)
    h = (h - mean) / jnp.sqrt(var_b + BN_EPS)
    h = h * params["bn_gamma"][None, :] + params["bn_beta"][None, :]
    a = jnp.where(h >= 0, h, LRELU_SLOPE * h)
    disc = a @ params["wd"].reshape(N_DISC, C_HID).T + params["bd"]
    mu = a @ params["wm"].reshape(C_HID) + params["bm"]
    var = jnp.exp(a @ params["wv"].reshape(C_HID) + params["bv"])
    return disc, mu, var


def qhead_reference_f32(x_nchw, params):
    """Plain-JAX, all-f32 reference matching the PyTorch forward (training BN)."""
    n = x_nchw.shape[0]
    x_flat = x_nchw.reshape(n, K_FLAT)
    h = x_flat @ params["w1"].reshape(C_HID, K_FLAT).T
    return _bn_lrelu_heads(h, params)


def qhead_reference_matched(x_nchw, params):
    """Same math, but conv1 uses the same bf16-quantized x/w1 as the kernel."""
    n = x_nchw.shape[0]
    x_flat = x_nchw.reshape(n, K_FLAT).astype(jnp.bfloat16)
    w1 = params["w1"].reshape(C_HID, K_FLAT).T.astype(jnp.bfloat16)
    h = jnp.dot(x_flat, w1, preferred_element_type=jnp.float32)
    return _bn_lrelu_heads(h, params)


def init_params(key):
    ks = jax.random.split(key, 8)
    s = lambda k, shape, scale: (scale * jax.random.normal(k, shape)).astype(jnp.float32)
    return {
        "w1": s(ks[0], (C_HID, C_IN, KH, KW), 0.02),
        "bn_gamma": jnp.ones((C_HID,), jnp.float32),
        "bn_beta": jnp.zeros((C_HID,), jnp.float32),
        "wd": s(ks[1], (N_DISC, C_HID, 1, 1), 0.05),
        "bd": s(ks[2], (N_DISC,), 0.05),
        "wm": s(ks[3], (1, C_HID, 1, 1), 0.05),
        "bm": s(ks[4], (1,), 0.05),
        "wv": s(ks[5], (1, C_HID, 1, 1), 0.05),
        "bv": s(ks[6], (1,), 0.05),
    }


if __name__ == "__main__":
    key = jax.random.PRNGKey(0)
    kp, kx = jax.random.split(key)
    params = init_params(kp)

    # One-time parameter packing (transposes / head fusion / bf16 cast) -- NOT
    # redone per forward call.
    packed = jax.block_until_ready(pack_params(params))

    # Channel/spatial dims are fixed by the module (256-ch, 4x4); small batch=8.
    N = 8
    x = jax.random.normal(kx, (N, C_IN, 4, 4), dtype=jnp.float32)

    disc, mu, var = jax.block_until_ready(qhead_forward(x, packed))

    assert disc.shape == (N, N_DISC) and mu.shape == (N,) and var.shape == (N,)

    # Correctness gate: reference using the same bf16-quantized conv1 inputs.
    disc_m, mu_m, var_m = qhead_reference_matched(x, params)
    assert jnp.allclose(disc, disc_m, atol=5e-3, rtol=5e-3)
    assert jnp.allclose(mu, mu_m, atol=5e-3, rtol=5e-3)
    assert jnp.allclose(var, var_m, atol=5e-3, rtol=5e-3)

    # Sanity vs. the all-f32 PyTorch-equivalent math (looser tolerance: the only
    # deviation is the bf16 cast of the conv1 weight/activation, an approved
    # perf optimization).
    disc_r, mu_r, var_r = qhead_reference_f32(x, params)
    assert jnp.allclose(disc, disc_r, atol=3e-2, rtol=3e-2)
    assert jnp.allclose(mu, mu_r, atol=3e-2, rtol=3e-2)
    assert jnp.allclose(var, var_r, atol=3e-2, rtol=3e-2)

    print("KERNEL_OK")
</pallas_src>

<mosaic_0001>
module attributes {stable_mosaic.version = 11 : i64} {
  func.func @qhead_kernel(%arg0: i32, %arg1: memref<8x1024xbf16, #tpu.memory_space<vmem>>, %arg2: memref<1024x128xbf16, #tpu.memory_space<vmem>>, %arg3: memref<1x128xf32, #tpu.memory_space<vmem>>, %arg4: memref<1x128xf32, #tpu.memory_space<vmem>>, %arg5: memref<128x128xf32, #tpu.memory_space<vmem>>, %arg6: memref<1x128xf32, #tpu.memory_space<vmem>>, %arg7: memref<8x128xf32, #tpu.memory_space<vmem>>, %arg8: memref<8x128xf32, #tpu.memory_space<vmem>>) attributes {dimension_semantics = [#tpu.dimension_semantics<arbitrary>], iteration_bounds = array<i64: 4>, scalar_prefetch = 0 : i64, scratch_operands = 1 : i64, tpu.core_type = #tpu.core_type<tc>, window_params = [{transform_indices = @transform_0, window_bounds = array<i64: 8, 1024>}, {transform_indices = @transform_1, window_bounds = array<i64: 1024, 128>}, {pipeline_mode = #tpu.pipeline_mode<synchronous>, transform_indices = @transform_2, window_bounds = array<i64: 1, 128>}, {pipeline_mode = #tpu.pipeline_mode<synchronous>, transform_indices = @transform_3, window_bounds = array<i64: 1, 128>}, {pipeline_mode = #tpu.pipeline_mode<synchronous>, transform_indices = @transform_4, window_bounds = array<i64: 128, 128>}, {pipeline_mode = #tpu.pipeline_mode<synchronous>, transform_indices = @transform_5, window_bounds = array<i64: 1, 128>}, {pipeline_mode = #tpu.pipeline_mode<synchronous>, transform_indices = @transform_6, window_bounds = array<i64: 8, 128>}]} {
    %c0_i32 = arith.constant 0 : i32
    %0 = arith.cmpi eq, %arg0, %c0_i32 : i32
    %1 = arith.extui %0 : i1 to i32
    %c0_i32_0 = arith.constant 0 : i32
    %2 = arith.cmpi ne, %1, %c0_i32_0 : i32
    scf.if %2 {
      %cst_9 = arith.constant 0.000000e+00 : f32
      %12 = vector.broadcast %cst_9 : f32 to vector<8x128xf32>
      %c0_10 = arith.constant 0 : index
      %c0_11 = arith.constant 0 : index
      %13 = vector.load %arg8[%c0_10, %c0_11] : memref<8x128xf32, #tpu.memory_space<vmem>>, vector<8x128xf32>
      tpu.vector_store %arg8[%c0_10, %c0_11], %12 {strides = array<i32>} : memref<8x128xf32, #tpu.memory_space<vmem>>, vector<8x128xf32>,
    } else {
    }
    %c0 = arith.constant 0 : index
    %c0_1 = arith.constant 0 : index
    %3 = vector.load %arg8[%c0, %c0_1] : memref<8x128xf32, #tpu.memory_space<vmem>>, vector<8x128xf32>
    %c0_2 = arith.constant 0 : index
    %c0_3 = arith.constant 0 : index
    %4 = vector.load %arg1[%c0_2, %c0_3] : memref<8x1024xbf16, #tpu.memory_space<vmem>>, vector<8x1024xbf16>
    %c0_4 = arith.constant 0 : index
    %c0_5 = arith.constant 0 : index
    %5 = vector.load %arg2[%c0_4, %c0_5] : memref<1024x128xbf16, #tpu.memory_space<vmem>>, vector<1024x128xbf16>
    %cst = arith.constant dense<0.000000e+00> : vector<8x128xf32>
    %6 = tpu.matmul %4, %5, %cst {dimension_numbers = #tpu.dot_dimension_numbers<[1], [0], [0], [1], [0, 0, 1, 1], [], []>} : vector<8x1024xbf16>, vector<1024x128xbf16>, vector<8x128xf32> -> vector<8x128xf32>
    %7 = arith.addf %3, %6 : vector<8x128xf32>
    %c0_6 = arith.constant 0 : index
    %c0_7 = arith.constant 0 : index
    %8 = vector.load %arg8[%c0_6, %c0_7] : memref<8x128xf32, #tpu.memory_space<vmem>>, vector<8x128xf32>
    tpu.vector_store %arg8[%c0_6, %c0_7], %7 {strides = array<i32>} : memref<8x128xf32, #tpu.memory_space<vmem>>, vector<8x128xf32>,
    %c3_i32 = arith.constant 3 : i32
    %9 = arith.cmpi eq, %arg0, %c3_i32 : i32
    %10 = arith.extui %9 : i1 to i32
    %c0_i32_8 = arith.constant 0 : i32
    %11 = arith.cmpi ne, %10, %c0_i32_8 : i32
    scf.if %11 {
      %c0_9 = arith.constant 0 : index
      %c0_10 = arith.constant 0 : index
      %12 = vector.load %arg8[%c0_9, %c0_10] : memref<8x128xf32, #tpu.memory_space<vmem>>, vector<8x128xf32>
      %cst_11 = arith.constant dense<0.000000e+00> : vector<128xf32>
      %13 = vector.multi_reduction <add>, %12, %cst_11 [0] : vector<8x128xf32> to vector<128xf32>
      %14 = vector.shape_cast %13 : vector<128xf32> to vector<1x128xf32>
      %cst_12 = arith.constant 8.000000e+00 : f32
      %15 = vector.broadcast %cst_12 : f32 to vector<1x128xf32>
      %16 = arith.divf %14, %15 : vector<1x128xf32>
      %17 = vector.broadcast %16 : vector<1x128xf32> to vector<8x128xf32>
      %18 = arith.subf %12, %17 : vector<8x128xf32>
      %19 = vector.broadcast %16 : vector<1x128xf32> to vector<8x128xf32>
      %20 = arith.subf %12, %19 : vector<8x128xf32>
      %21 = arith.mulf %18, %20 : vector<8x128xf32>
      %cst_13 = arith.constant dense<0.000000e+00> : vector<128xf32>
      %22 = vector.multi_reduction <add>, %21, %cst_13 [0] : vector<8x128xf32> to vector<128xf32>
      %23 = vector.shape_cast %22 : vector<128xf32> to vector<1x128xf32>
      %cst_14 = arith.constant 8.000000e+00 : f32
      %24 = vector.broadcast %cst_14 : f32 to vector<1x128xf32>
      %25 = arith.divf %23, %24 : vector<1x128xf32>
      %26 = vector.broadcast %16 : vector<1x128xf32> to vector<8x128xf32>
      %27 = arith.subf %12, %26 : vector<8x128xf32>
      %cst_15 = arith.constant 9.99999974E-6 : f32
      %28 = vector.broadcast %cst_15 : f32 to vector<1x128xf32>
      %29 = arith.addf %25, %28 : vector<1x128xf32>
      %30 = math.rsqrt %29 : vector<1x128xf32>
      %31 = vector.broadcast %30 : vector<1x128xf32> to vector<8x128xf32>
      %32 = arith.mulf %27, %31 : vector<8x128xf32>
      %c0_16 = arith.constant 0 : index
      %c0_17 = arith.constant 0 : index
      %33 = vector.load %arg3[%c0_16, %c0_17] : memref<1x128xf32, #tpu.memory_space<vmem>>, vector<1x128xf32>
      %34 = vector.broadcast %33 : vector<1x128xf32> to vector<8x128xf32>
      %35 = arith.mulf %32, %34 : vector<8x128xf32>
      %c0_18 = arith.constant 0 : index
      %c0_19 = arith.constant 0 : index
      %36 = vector.load %arg4[%c0_18, %c0_19] : memref<1x128xf32, #tpu.memory_space<vmem>>, vector<1x128xf32>
      %37 = vector.broadcast %36 : vector<1x128xf32> to vector<8x128xf32>
      %38 = arith.addf %35, %37 : vector<8x128xf32>
      %cst_20 = arith.constant 0.000000e+00 : f32
      %39 = vector.broadcast %cst_20 : f32 to vector<8x128xf32>
      %40 = arith.cmpf oge, %38, %39 : vector<8x128xf32>
      %cst_21 = arith.constant 1.000000e-01 : f32
      %41 = vector.broadcast %cst_21 : f32 to vector<8x128xf32>
      %42 = arith.mulf %41, %38 : vector<8x128xf32>
      %43 = arith.select %40, %38, %42 : vector<8x128xi1>, vector<8x128xf32>
      %c0_22 = arith.constant 0 : index
      %c0_23 = arith.constant 0 : index
      %44 = vector.load %arg5[%c0_22, %c0_23] : memref<128x128xf32, #tpu.memory_space<vmem>>, vector<128x128xf32>
      %cst_24 = arith.constant dense<0.000000e+00> : vector<8x128xf32>
      %45 = tpu.matmul %43, %44, %cst_24 {dimension_numbers = #tpu.dot_dimension_numbers<[1], [0], [0], [1], [0, 0, 1, 1], [], []>} : vector<8x128xf32>, vector<128x128xf32>, vector<8x128xf32> -> vector<8x128xf32>
      %c0_25 = arith.constant 0 : index
      %c0_26 = arith.constant 0 : index
      %46 = vector.load %arg6[%c0_25, %c0_26] : memref<1x128xf32, #tpu.memory_space<vmem>>, vector<1x128xf32>
      %47 = vector.broadcast %46 : vector<1x128xf32> to vector<8x128xf32>
      %48 = arith.addf %45, %47 : vector<8x128xf32>
      %49 = tpu.iota {dimensions = array<i32: 1>} : vector<8x128xi32>
      %c101_i32 = arith.constant 101 : i32
      %50 = vector.broadcast %c101_i32 : i32 to vector<8x128xi32>
      %51 = arith.cmpi eq, %49, %50 : vector<8x128xi32>
      %52 = math.exp %48 : vector<8x128xf32>
      %53 = arith.select %51, %52, %48 : vector<8x128xi1>, vector<8x128xf32>
      %c0_27 = arith.constant 0 : index
      %c0_28 = arith.constant 0 : index
      %54 = vector.load %arg7[%c0_27, %c0_28] : memref<8x128xf32, #tpu.memory_space<vmem>>, vector<8x128xf32>
      tpu.vector_store %arg7[%c0_27, %c0_28], %53 {strides = array<i32>} : memref<8x128xf32, #tpu.memory_space<vmem>>, vector<8x128xf32>,
    } else {
    }
    return
  }
  func.func @transform_0(%arg0: i32) -> (i32, i32) {
    %c0_i32 = arith.constant 0 : i32
    %c0_i32_0 = arith.constant 0 : i32
    return %c0_i32, %arg0 : i32, i32
  }
  func.func @transform_1(%arg0: i32) -> (i32, i32) {
    %c0_i32 = arith.constant 0 : i32
    %c0_i32_0 = arith.constant 0 : i32
    return %arg0, %c0_i32 : i32, i32
  }
  func.func @transform_2(%arg0: i32) -> (i32, i32) {
    %c0_i32 = arith.constant 0 : i32
    %c0_i32_0 = arith.constant 0 : i32
    %c0_i32_1 = arith.constant 0 : i32
    return %c0_i32, %c0_i32_0 : i32, i32
  }
  func.func @transform_3(%arg0: i32) -> (i32, i32) {
    %c0_i32 = arith.constant 0 : i32
    %c0_i32_0 = arith.constant 0 : i32
    %c0_i32_1 = arith.constant 0 : i32
    return %c0_i32, %c0_i32_0 : i32, i32
  }
  func.func @transform_4(%arg0: i32) -> (i32, i32) {
    %c0_i32 = arith.constant 0 : i32
    %c0_i32_0 = arith.constant 0 : i32
    %c0_i32_1 = arith.constant 0 : i32
    return %c0_i32, %c0_i32_0 : i32, i32
  }
  func.func @transform_5(%arg0: i32) -> (i32, i32) {
    %c0_i32 = arith.constant 0 : i32
    %c0_i32_0 = arith.constant 0 : i32
    %c0_i32_1 = arith.constant 0 : i32
    return %c0_i32, %c0_i32_0 : i32, i32
  }
  func.func @transform_6(%arg0: i32) -> (i32, i32) {
    %c0_i32 = arith.constant 0 : i32
    %c0_i32_0 = arith.constant 0 : i32
    %c0_i32_1 = arith.constant 0 : i32
    return %c0_i32, %c0_i32_0 : i32, i32
  }
}

</mosaic_0001>

<bundles_post_ra>
// kernel: qhead_forward.1
= control target key start
LH: loop header
LB: loop body
LE: loop exit
PB: predicated region body
PF: predicated region fallthrough
CT: control target
= control target key end

     0   :  { %s1453_s21 = smov 0   ;;  %s1608_s0 = inlined_call_operand.vmem [shape: bf16[8,4096], index: 0, kind: input, shape index: {}]   ;;  %s1609_s1 = inlined_call_operand.vmem [shape: bf16[4096,128], index: 1, kind: input, shape index: {}]   ;;  %s1610_s2 = inlined_call_operand.vmem [shape: f32[1,128], index: 2, kind: input, shape index: {}]   ;;  %s1611_s3 = inlined_call_operand.vmem [shape: f32[1,128], index: 3, kind: input, shape index: {}]   ;;  %s1612_s4 = inlined_call_operand.vmem [shape: f32[128,128], index: 4, kind: input, shape index: {}]   ;;  %s1613_s5 = inlined_call_operand.vmem [shape: f32[1,128], index: 5, kind: input, shape index: {}]   ;;  %s1614_s6 = inlined_call_operand.vmem [shape: f32[8,128], index: 6, kind: output, shape index: {}]  }
   0x1 LB: > { %s1459_s22 = sadd.s32 4294967295, %s1414_s21   ;;  %p1060_p0 = scmp.ge.s32.totalorder %s1414_s21, 1  ;;  %s1414_s21 = sphi %s1453_s21, %s16_s21  }
   0x2   : > { %p219_p1 = scmp.lt.s32.totalorder %s1414_s21, 5 }
   0x4   : > { %p220_p2 = pnand %p1060_p0, %p219_p1 }
   0x5   : > { %s1061_s23 = sshll.u32 (!%p220_p2), %s1459_s22, 3  ;;  %s1063_s24 = sshll.u32 (!%p220_p2), %s1459_s22, 7 }
   0x6   : > { %223 = sbr.rel (%p220_p2) target bundleno = 433 (0x1b1), region = 44  ;;  %p250_p3 = scmp.lt.s32.totalorder (!%p220_p2), %s1061_s23, 31 }
   0x7   : > { %p256_p4 = scmp.lt.s32.totalorder (!%p220_p2), %s1063_s24, 511  ;;  %p1065_p5 = scmp.ne.s32.totalorder (!%p220_p2), %s1459_s22, 0 }
   0xb   : > { %s1616_s23 = smov (!%p250_p3, %s1061_s23), 31  ;;  %s1618_s24 = smov (!%p256_p4, %s1063_s24), 511 }
   0xc   : > { %s1062_s25 = sshll.u32 %s1616_s23, 2  ;;  %s1064_s29 = sshll.u32 %s1618_s24, 2 }
   0xd   : > { %s1468_s28 = scalar_lea.vmem %s1608_s0, %s1062_s25  ;;  %s1473_s8 = scalar_lea.vmem %s1609_s1, %s1064_s29 }
   0xe   : > { %264 = sbr.rel (%p1065_p5) target bundleno = 21 (0x15), region = 48 }
  0x13   : > { %v1416_v0 = vmov 0.0  }
  0x14   : > { %265 = vst [vmem:[#allocation2] sm:$0xff] %v1416_v0 }
  0x15 PF: > { %v1332_v1 = vld [vmem:[%s1473_s8 + $0x38] sm:$0xff]  ;;  %v1331_v5 = vld [vmem:[%s1473_s8 + $0x30] sm:$0xff]  ;;  %v1330_v9 = vld [vmem:[%s1473_s8 + $0x28] sm:$0xff]  ;;  %p1322_p6 = scmp.ne.s32.totalorder %s1459_s22, 3 }
  0x16   : > { %v1340_v2 = vld [vmem:[%s1473_s8 + $0x78] sm:$0xff]  ;;  %811 = vmatpush.bf16.msra.mxu0 %v1332_v1  ;;  %v1339_v6 = vld [vmem:[%s1473_s8 + $0x70] sm:$0xff]  ;;  %v1338_v10 = vld [vmem:[%s1473_s8 + $0x68] sm:$0xff] }
  0x17   : > { %v1348_v3 = vld [vmem:[%s1473_s8 + $0xb8] sm:$0xff]  ;;  %824 = vmatpush.bf16.msra.mxu1 %v1340_v2  ;;  %v1347_v7 = vld [vmem:[%s1473_s8 + $0xb0] sm:$0xff]  ;;  %v1346_v11 = vld [vmem:[%s1473_s8 + $0xa8] sm:$0xff] }
  0x18   : > { %v1356_v4 = vld [vmem:[%s1473_s8 + $0xf8] sm:$0xff]  ;;  %837 = vmatpush.bf16.msra.mxu2 %v1348_v3  ;;  %v1355_v8 = vld [vmem:[%s1473_s8 + $0xf0] sm:$0xff]  ;;  %v1354_v12 = vld [vmem:[%s1473_s8 + $0xe8] sm:$0xff] }
  0x19   : > { %850 = vmatpush.bf16.msra.mxu3 %v1356_v4  ;;  %v1329_v13 = vld [vmem:[%s1473_s8 + $0x20] sm:$0xff]  ;;  %v1328_v17 = vld [vmem:[%s1473_s8 + $0x18] sm:$0xff]  ;;  %v1327_v21 = vld [vmem:[%s1473_s8 + $0x10] sm:$0xff] }
  0x1a   : > { %812 = vmatpush.bf16.msra.mxu0 %v1331_v5  ;;  %v1337_v14 = vld [vmem:[%s1473_s8 + $0x60] sm:$0xff]  ;;  %v1336_v18 = vld [vmem:[%s1473_s8 + $0x58] sm:$0xff]  ;;  %v1335_v22 = vld [vmem:[%s1473_s8 + $0x50] sm:$0xff] }
  0x1b   : > { %825 = vmatpush.bf16.msra.mxu1 %v1339_v6  ;;  %v1345_v15 = vld [vmem:[%s1473_s8 + $0xa0] sm:$0xff]  ;;  %v1344_v19 = vld [vmem:[%s1473_s8 + $0x98] sm:$0xff]  ;;  %v1343_v23 = vld [vmem:[%s1473_s8 + $0x90] sm:$0xff] }
  0x1c   : > { %838 = vmatpush.bf16.msra.mxu2 %v1347_v7  ;;  %v1353_v16 = vld [vmem:[%s1473_s8 + $0xe0] sm:$0xff]  ;;  %v1352_v20 = vld [vmem:[%s1473_s8 + $0xd8] sm:$0xff]  ;;  %v1351_v24 = vld [vmem:[%s1473_s8 + $0xd0] sm:$0xff] }
  0x1d   : > { %851 = vmatpush.bf16.msra.mxu3 %v1355_v8  ;;  %v1326_v25 = vld [vmem:[%s1473_s8 + $0x8] sm:$0xff]  ;;  %v267_v30 = vld [vmem:[%s1468_s28] sm:$0xff]  ;;  %v1364_v39 = vld [vmem:[%s1473_s8 + $0x138] sm:$0xff] }
  0x1e   : > { %813 = vmatpush.bf16.msra.mxu0 %v1330_v9  ;;  %v1334_v26 = vld [vmem:[%s1473_s8 + $0x48] sm:$0xff]  ;;  %v1325_v31 = vld [vmem:[%s1473_s8] sm:$0xff]  ;;  %v403_v37 = vunpack.c.l.b16 %v267_v30  ;;  %v404_v38 = vunpack.c.h.b16 %v267_v30  ;;  %v1372_v40 = vld [vmem:[%s1473_s8 + $0x178] sm:$0xff] }
  0x1f   : > { %826 = vmatpush.bf16.msra.mxu1 %v1338_v10  ;;  %v1342_v27 = vld [vmem:[%s1473_s8 + $0x88] sm:$0xff]  ;;  %v1333_v32 = vld [vmem:[%s1473_s8 + $0x40] sm:$0xff]  ;;  %v1380_v41 = vld [vmem:[%s1473_s8 + $0x1b8] sm:$0xff] }
  0x20   : > { %839 = vmatpush.bf16.msra.mxu2 %v1346_v11  ;;  %v1350_v28 = vld [vmem:[%s1473_s8 + $0xc8] sm:$0xff]  ;;  %v1341_v35 = vld [vmem:[%s1473_s8 + $0x80] sm:$0xff]  ;;  %v1388_v42 = vld [vmem:[%s1473_s8 + $0x1f8] sm:$0xff]  ;;  %v411_v45 = vpack.c.b16 %v403_v37, %v403_v37  ;;  %v412_v46 = vpack.c.b16 %v404_v38, %v404_v38 }
  0x21   : > { %852 = vmatpush.bf16.msra.mxu3 %v1354_v12  ;;  %v268_v29 = vld [vmem:[%s1468_s28 + $0x8] sm:$0xff]  ;;  %v1349_v36 = vld [vmem:[%s1473_s8 + $0xc0] sm:$0xff]  ;;  %v1363_v47 = vld [vmem:[%s1473_s8 + $0x130] sm:$0xff] }
  0x22   : > { %814 = vmatpush.bf16.msra.mxu0 %v1329_v13  ;;  %v405_v33 = vunpack.c.l.b16 %v268_v29  ;;  %v406_v34 = vunpack.c.h.b16 %v268_v29  ;;  %v1371_v48 = vld [vmem:[%s1473_s8 + $0x170] sm:$0xff]  ;;  %v1362_v51 = vld [vmem:[%s1473_s8 + $0x128] sm:$0xff]  ;;  %v1361_v55 = vld [vmem:[%s1473_s8 + $0x120] sm:$0xff] }
  0x23   : > { %827 = vmatpush.bf16.msra.mxu1 %v1337_v14  ;;  %v1379_v49 = vld [vmem:[%s1473_s8 + $0x1b0] sm:$0xff]  ;;  %v1370_v52 = vld [vmem:[%s1473_s8 + $0x168] sm:$0xff]  ;;  %v1369_v56 = vld [vmem:[%s1473_s8 + $0x160] sm:$0xff] }
  0x24   : > { %840 = vmatpush.bf16.msra.mxu2 %v1345_v15  ;;  %v413_v43 = vpack.c.b16 %v405_v33, %v405_v33  ;;  %v414_v44 = vpack.c.b16 %v406_v34, %v406_v34  ;;  %v1387_v50 = vld [vmem:[%s1473_s8 + $0x1f0] sm:$0xff]  ;;  %v1378_v53 = vld [vmem:[%s1473_s8 + $0x1a8] sm:$0xff]  ;;  %v1377_v57 = vld [vmem:[%s1473_s8 + $0x1a0] sm:$0xff] }
  0x25   : > { %853 = vmatpush.bf16.msra.mxu3 %v1353_v16  ;;  %v1386_v54 = vld [vmem:[%s1473_s8 + $0x1e8] sm:$0xff]  ;;  %v1385_v58 = vld [vmem:[%s1473_s8 + $0x1e0] sm:$0xff]  ;;  %v1360_v59 = vld [vmem:[%s1473_s8 + $0x118] sm:$0xff] }
  0x26   : > { %815 = vmatpush.bf16.msra.mxu0 %v1328_v17  ;;  %v1368_v60 = vld [vmem:[%s1473_s8 + $0x158] sm:$0xff]  ;;  %v1359_v63 = vld [vmem:[%s1473_s8 + $0x110] sm:$0xff]  ;;  %v1358_v3 = vld [vmem:[%s1473_s8 + $0x108] sm:$0xff] }
  0x27   : > { %828 = vmatpush.bf16.msra.mxu1 %v1336_v18  ;;  %v1376_v61 = vld [vmem:[%s1473_s8 + $0x198] sm:$0xff]  ;;  %v1367_v0 = vld [vmem:[%s1473_s8 + $0x150] sm:$0xff]  ;;  %v1366_v4 = vld [vmem:[%s1473_s8 + $0x148] sm:$0xff] }
  0x28   : > { %841 = vmatpush.bf16.msra.mxu2 %v1344_v19  ;;  %v1384_v62 = vld [vmem:[%s1473_s8 + $0x1d8] sm:$0xff]  ;;  %v1375_v1 = vld [vmem:[%s1473_s8 + $0x190] sm:$0xff]  ;;  %v1374_v6 = vld [vmem:[%s1473_s8 + $0x188] sm:$0xff] }
  0x29   : > { %854 = vmatpush.bf16.msra.mxu3 %v1352_v20  ;;  %v1383_v2 = vld [vmem:[%s1473_s8 + $0x1d0] sm:$0xff]  ;;  %v1382_v7 = vld [vmem:[%s1473_s8 + $0x1c8] sm:$0xff]  ;;  %v270_v8 = vld [vmem:[%s1468_s28 + $0x18] sm:$0xff] }
  0x2a   : > { %816 = vmatpush.bf16.msra.mxu0 %v1327_v21  ;;  %v269_v5 = vld [vmem:[%s1468_s28 + $0x10] sm:$0xff]  ;;  %v1357_v11 = vld [vmem:[%s1473_s8 + $0x100] sm:$0xff]  ;;  %v409_v13 = vunpack.c.l.b16 %v270_v8  ;;  %v410_v14 = vunpack.c.h.b16 %v270_v8 }
  0x2b   : > { %829 = vmatpush.bf16.msra.mxu1 %v1335_v22  ;;  %v407_v9 = vunpack.c.l.b16 %v269_v5  ;;  %v408_v10 = vunpack.c.h.b16 %v269_v5  ;;  %v1365_v12 = vld [vmem:[%s1473_s8 + $0x140] sm:$0xff] }
  0x2c   : > { %842 = vmatpush.bf16.msra.mxu2 %v1343_v23  ;;  %v1373_v15 = vld [vmem:[%s1473_s8 + $0x180] sm:$0xff]  ;;  %v417_v19 = vpack.c.b16 %v409_v13, %v409_v13  ;;  %v418_v20 = vpack.c.b16 %v410_v14, %v410_v14 }
  0x2d   : > { %855 = vmatpush.bf16.msra.mxu3 %v1351_v24  ;;  %v1381_v16 = vld [vmem:[%s1473_s8 + $0x1c0] sm:$0xff]  ;;  %v415_v17 = vpack.c.b16 %v407_v9, %v407_v9  ;;  %v416_v18 = vpack.c.b16 %v408_v10, %v408_v10 }
  0x2e   : > { %817 = vmatpush.bf16.msra.mxu0 %v1326_v25 }
  0x2f   : > { %830 = vmatpush.bf16.msra.mxu1 %v1334_v26 }
  0x30   : > { %843 = vmatpush.bf16.msra.mxu2 %v1342_v27 }
  0x31   : > { %856 = vmatpush.bf16.msra.mxu3 %v1350_v28 }
  0x32   : > { %818 = vmatpush.bf16.msra.mxu0 %v1325_v31 }
  0x33   : > { %831 = vmatpush.bf16.msra.mxu1 %v1333_v32 }
  0x34   : > { %844 = vmatpush.bf16.msra.mxu2 %v1341_v35 }
  0x35   : > { %857 = vmatpush.bf16.msra.mxu3 %v1349_v36  ;;  %819 = vmatmul.bf16.vlgmr.msra.gmra.mxu0 %v411_v45 }
  0x36   : > { %863 = vmatpush.bf16.msrb.mxu0 %v1364_v39  ;;  %832 = vmatmul.bf16.vlgmr.msra.gmra.mxu1 %v412_v46 }
  0x37   : > { %876 = vmatpush.bf16.msrb.mxu1 %v1372_v40  ;;  %845 = vmatmul.bf16.vlgmr.msra.gmra.mxu2 %v413_v43 }
  0x38   : > { %889 = vmatpush.bf16.msrb.mxu2 %v1380_v41  ;;  %858 = vmatmul.bf16.vlgmr.msra.gmra.mxu3 %v414_v44  ;;  %v266_v41 = vld [vmem:[#allocation2] sm:$0xff] }
  0x39   : > { %902 = vmatpush.bf16.msrb.mxu3 %v1388_v42 }
  0x3a   : > { %864 = vmatpush.bf16.msrb.mxu0 %v1363_v47 }
  0x3b   : > { %877 = vmatpush.bf16.msrb.mxu1 %v1371_v48 }
  0x3c   : > { %890 = vmatpush.bf16.msrb.mxu2 %v1379_v49 }
  0x3d   : > { %903 = vmatpush.bf16.msrb.mxu3 %v1387_v50 }
  0x3e   : > { %865 = vmatpush.bf16.msrb.mxu0 %v1362_v51 }
  0x3f   : > { %878 = vmatpush.bf16.msrb.mxu1 %v1370_v52 }
  0x40   : > { %891 = vmatpush.bf16.msrb.mxu2 %v1378_v53 }
  0x41   : > { %904 = vmatpush.bf16.msrb.mxu3 %v1386_v54 }
  0x42   : > { %866 = vmatpush.bf16.msrb.mxu0 %v1361_v55 }
  0x43   : > { %879 = vmatpush.bf16.msrb.mxu1 %v1369_v56 }
  0x44   : > { %892 = vmatpush.bf16.msrb.mxu2 %v1377_v57 }
  0x45   : > { %905 = vmatpush.bf16.msrb.mxu3 %v1385_v58 }
  0x46   : > { %867 = vmatpush.bf16.msrb.mxu0 %v1360_v59 }
  0x47   : > { %880 = vmatpush.bf16.msrb.mxu1 %v1368_v60 }
  0x48   : > { %893 = vmatpush.bf16.msrb.mxu2 %v1376_v61 }
  0x49   : > { %906 = vmatpush.bf16.msrb.mxu3 %v1384_v62 }
  0x4a   : > { %868 = vmatpush.bf16.msrb.mxu0 %v1359_v63 }
  0x4b   : > { %881 = vmatpush.bf16.msrb.mxu1 %v1367_v0 }
  0x4c   : > { %894 = vmatpush.bf16.msrb.mxu2 %v1375_v1 }
  0x4d   : > { %907 = vmatpush.bf16.msrb.mxu3 %v1383_v2 }
  0x4e   : > { %869 = vmatpush.bf16.msrb.mxu0 %v1358_v3 }
  0x4f   : > { %882 = vmatpush.bf16.msrb.mxu1 %v1366_v4 }
  0x50   : > { %895 = vmatpush.bf16.msrb.mxu2 %v1374_v6 }
  0x51   : > { %908 = vmatpush.bf16.msrb.mxu3 %v1382_v7 }
  0x52   : > { %870 = vmatpush.bf16.msrb.mxu0 %v1357_v11 }
  0x53   : > { %883 = vmatpush.bf16.msrb.mxu1 %v1365_v12 }
  0x54   : > { %896 = vmatpush.bf16.msrb.mxu2 %v1373_v15 }
  0x55   : > { %909 = vmatpush.bf16.msrb.mxu3 %v1381_v16  ;;  %871 = vmatmul.bf16.vlgmr.msrb.gmra.mxu0 %v415_v17 }
  0x56   : > { %884 = vmatmul.bf16.vlgmr.msrb.gmra.mxu1 %v416_v18 }
  0x57   : > { %897 = vmatmul.bf16.vlgmr.msrb.gmra.mxu2 %v417_v19 }
  0x58   : > { %910 = vmatmul.bf16.vlgmr.msrb.gmra.mxu3 %v418_v20 }
  0xb2   : > { %v820_v21 = vpop.f32.mrf.mxu0 }
  0xb3   : > { %v833_v22 = vpop.f32.mrf.mxu1 }
  0xb4   : > { %v834_v29 = vadd.f32 %v833_v22, %v820_v21 }
  0xba   : > { %v846_v23 = vpop.f32.mrf.mxu2  ;;  %v822_v25 = vpop.f32.mrf.mxu0 }
  0xbb   : > { %v859_v24 = vpop.f32.mrf.mxu3  ;;  %v835_v26 = vpop.f32.mrf.mxu1  ;;  %v847_v30 = vadd.f32 %v846_v23, %v834_v29 }
  0xbd   : > { %v860_v31 = vadd.f32 %v859_v24, %v847_v30 }
  0xc2   : > { %v848_v27 = vpop.f32.mrf.mxu2 }
  0xc3   : > { %v861_v28 = vpop.f32.mrf.mxu3 }
  0xd2   : > { %v872_v32 = vpop.f32.mrf.mxu0 }
  0xd3   : > { %v885_v33 = vpop.f32.mrf.mxu1  ;;  %v873_v34 = vadd.f32 %v872_v32, %v860_v31 }
  0xd5   : > { %v886_v35 = vadd.f32 %v885_v33, %v873_v34 }
  0xda   : > { %v898_v36 = vpop.f32.mrf.mxu2  ;;  %v874_v39 = vpop.f32.mrf.mxu0 }
  0xdb   : > { %v911_v37 = vpop.f32.mrf.mxu3  ;;  %v899_v38 = vadd.f32 %v898_v36, %v886_v35  ;;  %v887_v40 = vpop.f32.mrf.mxu1 }
  0xdd   : > { %v912_v42 = vadd.f32 %v911_v37, %v899_v38 }
  0xdf   : > { %v915_v43 = vadd.f32 %v912_v42, %v266_v41  ;;  %920 = sbr.rel (%p1322_p6) target bundleno = 433 (0x1b1), region = 52 }
  0xe1   : > { %916 = vst [vmem:[#allocation2] sm:$0xff] %v915_v43 }
  0xe2   : > { %v900_v44 = vpop.f32.mrf.mxu2 }
  0xe3   : > { %v913_v45 = vpop.f32.mrf.mxu3 }
  0xe4   : > { %v985_v46 = vld [vmem:[%s1612_s4 + $0x78] sm:$0xff]  ;;  %v984_v47 = vld [vmem:[%s1612_s4 + $0x70] sm:$0xff]  ;;  %v1417_v48 = vmov 8.0   ;;  %v983_v49 = vld [vmem:[%s1612_s4 + $0x68] sm:$0xff]  ;;  %v1010_v40 = vlaneseq }
  0xe5   : > { %990 = vmatpush.msra.mxu0 %v985_v46  ;;  %1402 = vrcp.f32 %v1417_v48  ;;  %v982_v50 = vld [vmem:[%s1612_s4 + $0x60] sm:$0xff]  ;;  %v981_v52 = vld [vmem:[%s1612_s4 + $0x58] sm:$0xff]  ;;  %v980_v55 = vld [vmem:[%s1612_s4 + $0x50] sm:$0xff] }
  0xe6   : > { %v979_v58 = vld [vmem:[%s1612_s4 + $0x48] sm:$0xff]  ;;  %v978_v61 = vld [vmem:[%s1612_s4 + $0x40] sm:$0xff]  ;;  %v977_v0 = vld [vmem:[%s1612_s4 + $0x38] sm:$0xff]  ;;  %v1011_v42 = vand.u32 127, %v1010_v40 }
  0xe7   : > { %991 = vmatpush.msra.mxu0 %v984_v47  ;;  %v976_v3 = vld [vmem:[%s1612_s4 + $0x30] sm:$0xff]  ;;  %v975_v6 = vld [vmem:[%s1612_s4 + $0x28] sm:$0xff]  ;;  %v974_v8 = vld [vmem:[%s1612_s4 + $0x20] sm:$0xff] }
  0xe8   : > { %v921_v51 = vld [vmem:[#allocation2] sm:$0xff]  ;;  %v973_v10 = vld [vmem:[%s1612_s4 + $0x18] sm:$0xff]  ;;  %v972_v12 = vld [vmem:[%s1612_s4 + $0x10] sm:$0xff]  ;;  %vm1012_vm5 = vcmp.eq.s32.totalorder %v1011_v42, 101 }
  0xe9   : > { %992 = vmatpush.msra.mxu0 %v983_v49  ;;  %v922_v53 = vrot.slane %v921_v51, 4  ;;  %v971_v14 = vld [vmem:[%s1612_s4 + $0x8] sm:$0xff]  ;;  %v970_v16 = vld [vmem:[%s1612_s4] sm:$0xff] }
  0xea   : > { %v1399_v29 = vld [vmem:[%s1610_s2] ss:$0 sm:$0xff] }
  0xeb   : > { %v1403_v54 = vpop.eup %1402  ;;  %993 = vmatpush.msra.mxu0 %v982_v50  ;;  %v923_v56 = vadd.f32 %v922_v53, %v921_v51  ;;  %v1400_v32 = vld [vmem:[%s1611_s3] ss:$0 sm:$0xff] }
  0xec   : > { %v929_v57 = vmul.f32 8.0, %v1403_v54  ;;  %vm933_vm0 = vweird.f32 %v1403_v54  ;;  %v1401_v37 = vld [vmem:[%s1613_s5] ss:$0 sm:$0xff] }
  0xed   : > { %994 = vmatpush.msra.mxu0 %v981_v52  ;;  %v924_v59 = vrot.slane %v923_v56, 2 }
  0xee   : > { %v930_v60 = vsub.f32 1.0, %v929_v57 }
  0xef   : > { %995 = vmatpush.msra.mxu0 %v980_v55  ;;  %v925_v62 = vadd.f32 %v924_v59, %v923_v56 }
  0xf0   : > { %v931_v63 = vmul.f32 %v1403_v54, %v930_v60 }
  0xf1   : > { %996 = vmatpush.msra.mxu0 %v979_v58  ;;  %v926_v1 = vrot.slane %v925_v62, 1 }
  0xf2   : > { %v932_v2 = vadd.f32 %v1403_v54, %v931_v63 }
  0xf3   : > { %997 = vmatpush.msra.mxu0 %v978_v61  ;;  %v927_v4 = vadd.f32 %v926_v1, %v925_v62 }
  0xf4   : > { %v934_v5 = vsel %vm933_vm0, %v1403_v54, %v932_v2 }
  0xf5   : > { %998 = vmatpush.msra.mxu0 %v977_v0  ;;  %v935_v7 = vmul.f32 %v934_v5, %v927_v4 }
  0xf7   : > { %999 = vmatpush.msra.mxu0 %v976_v3  ;;  %v936_v9 = vsub.f32 %v921_v51, %v935_v7 }
  0xf9   : > { %1000 = vmatpush.msra.mxu0 %v975_v6  ;;  %v937_v11 = vmul.f32 %v936_v9, %v936_v9 }
  0xfb   : > { %1001 = vmatpush.msra.mxu0 %v974_v8  ;;  %v938_v13 = vrot.slane %v937_v11, 4 }
  0xfd   : > { %1002 = vmatpush.msra.mxu0 %v973_v10  ;;  %v939_v15 = vadd.f32 %v938_v13, %v937_v11 }
  0xff   : > { %1003 = vmatpush.msra.mxu0 %v972_v12  ;;  %v940_v17 = vrot.slane %v939_v15, 2 }
 0x101   : > { %1004 = vmatpush.msra.mxu0 %v971_v14  ;;  %v941_v18 = vadd.f32 %v940_v17, %v939_v15 }
 0x103   : > { %1005 = vmatpush.msra.mxu0 %v970_v16  ;;  %v942_v19 = vrot.slane %v941_v18, 1 }
 0x105   : > { %v943_v20 = vadd.f32 %v942_v19, %v941_v18 }
 0x107   : > { %v944_v21 = vmul.f32 %v943_v20, %v934_v5 }
 0x109   : > { %v945_v22 = vadd.f32 1e-05, %v944_v21 }
 0x10b   : > { %1404 = vrsqrt.f32 %v945_v22  ;;  %vm952_vm1 = vweird.f32 %v945_v22 }
 0x111   : > { %v1405_v23 = vpop.eup %1404 }
 0x112   : > { %v947_v24 = vmul.f32 %v1405_v23, %v945_v22  ;;  %vm953_vm2 = vweird.f32 %v1405_v23 }
 0x113   : > { %vm954_vm3 = vmor %vm952_vm1, %vm953_vm2 }
 0x114   : > { %v948_v25 = vmul.f32 %v1405_v23, %v947_v24 }
 0x116   : > { %v949_v26 = vmul.f32 0.5, %v948_v25 }
 0x118   : > { %v950_v27 = vsub.f32 1.5, %v949_v26 }
 0x11a   : > { %v951_v28 = vmul.f32 %v1405_v23, %v950_v27 }
 0x11c   : > { %v955_v30 = vsel %vm954_vm3, %v1405_v23, %v951_v28 }
 0x11d   : > { %v956_v31 = vmul.f32 %v955_v30, %v936_v9 }
 0x11f   : > { %v961_v33 = vmul.f32 %v1399_v29, %v956_v31 }
 0x121   : > { %v966_v34 = vadd.f32 %v1400_v32, %v961_v33 }
 0x123   : > { %vm967_vm4 = vcmp.ge.f32.partialorder %v966_v34, 0.0  ;;  %v968_v35 = vmul.f32 0.1, %v966_v34 }
 0x125   : > { %v969_v36 = vsel %vm967_vm4, %v966_v34, %v968_v35 }
 0x126   : > { %1006 = vmatmul.f32.vlgmr.msra.gmra.mxu0 %v969_v36 }
 0x1a3   : > { %v1007_v38 = vpop.f32.mrf.mxu0 }
 0x1a4   : > { %v1008_v39 = vadd.f32 %v1401_v37, %v1007_v38 }
 0x1a6   : > { %v1013_v41 = vmul.f32 1.442695, %v1008_v39 }
 0x1a8   : > { %1406 = vpow2.f32 %v1013_v41 }
 0x1ae   : > { %v1407_v43 = vpop.eup %1406 }
 0x1af   : > { %v1015_v44 = vsel %vm1012_vm5, %v1407_v43, %v1008_v39 }
 0x1b0   : > { %1016 = vst [vmem:[%s1614_s6] sm:$0xff] %v1015_v44 }
 0x1b1 PF: > { %s16_s21 = sadd.s32 1, %s1414_s21  }
 0x1b2   : > { %p13_p7 = scmp.ge.s32.totalorder %s16_s21, 6  }
 0x1b4   :  { %15 = sbr.rel (!%p13_p7) target bundleno = 1 (0x1), region = 81 }

</bundles_post_ra>
